<compile_context>
chip_gen: v7x
topology: tpu7x:2x2x1
jax: 0.10.0
libtpu: 0.0.40
codegen_flags: <defaults>
</compile_context>

<pallas_src>
import functools

import jax
import jax.numpy as jnp
from jax.experimental import pallas as pl
from jax.experimental.pallas import tpu as pltpu


# ----------------------------- Pallas kernel ------------------------------- #

def _sage_fused_kernel(*refs, layer_sizes, num_layers):
    """All SAGEConv layers fused; intermediate activations stay in VMEM.

    refs layout:
      [A_count_0 .. A_count_{L-1}]        # bf16 [n_tgt_i, n_src_i] raw counts
      [inv_deg_0 .. inv_deg_{L-1}]        # f32  [n_tgt_i, 1]  (exact 1/deg)
      x                                   # bf16 [n_src_0, C_in]
      (w_cat_i, b_i) for i in 0..L-1      # bf16 [2*C_i, C_{i+1}], f32 [1, C_{i+1}]
      out                                 # f32  [n_tgt_{L-1}, C_out]
      h_scratch_0 .. h_scratch_{L-2}      # VMEM bf16, [n_tgt_i, C_{i+1}]
    """
    idx = 0
    a_refs = refs[idx:idx + num_layers]; idx += num_layers
    inv_refs = refs[idx:idx + num_layers]; idx += num_layers
    x_ref = refs[idx]; idx += 1
    p_refs = refs[idx:idx + 2 * num_layers]; idx += 2 * num_layers
    out_ref = refs[idx]; idx += 1
    h_refs = refs[idx:]                      # num_layers - 1 VMEM scratch refs

    src_ref = x_ref                          # source features of current layer
    for i in range(num_layers):
        _, n_tgt = layer_sizes[i]
        w_cat = p_refs[2 * i][...]           # bf16 [2*C_in, C_out]
        bias = p_refs[2 * i + 1][...]        # f32  [1, C_out]

        # --- mean aggregation: (A_count @ X) * inv_deg (inv_deg precomputed).
        agg = jnp.dot(a_refs[i][...], src_ref[...],
                      preferred_element_type=jnp.float32) * inv_refs[i][...]

        # --- fused lin_l + lin_r:  [agg | x_target] @ [W_l ; W_r] + b_l.
        h_tgt = src_ref[pl.ds(0, n_tgt), :]                  # x[:n_tgt], bf16
        operand = jnp.concatenate([agg.astype(jnp.bfloat16), h_tgt], axis=-1)
        out = jnp.dot(operand, w_cat, preferred_element_type=jnp.float32) + bias

        if i != num_layers - 1:
            # ReLU in f32, store bf16 (value is cast to bf16 at the next MXU
            # anyway).  F.dropout(p=0.5, training=False) -> identity.
            h_refs[i][...] = jnp.maximum(out, 0.0).astype(jnp.bfloat16)
            src_ref = h_refs[i]
        else:
            out_ref[...] = out.astype(out_ref.dtype)


def sage_forward(x, adjs, params):
    """Mirrors SAGE.forward(x, adjs) in eval mode, as one fused Pallas call.

    x      : [n_src_0, C_in] node features (f32; cast to bf16 for the MXU)
    adjs   : list of (edge_index[2, E], (n_src, n_tgt)) sampled bipartite graphs
    params : list of (w_l [C_in, C_out], b_l [1, C_out], w_r [C_in, C_out])
    """
    num_layers = len(params)
    assert len(adjs) == num_layers
    layer_sizes = tuple((int(s[0]), int(s[1])) for (_, s) in adjs)

    # Count adjacency (exact small-int values -> exact in bf16) and exact f32
    # inverse degrees, both built in the wrapper (O(E) scatter runs here).
    a_counts, inv_degs = [], []
    for (ei, (ns, nt)) in adjs:
        counts = build_count_adjacency(ei, ns, nt)           # f32 counts
        deg = jnp.sum(counts, axis=1, keepdims=True)         # [n_tgt, 1]
        inv_degs.append(1.0 / jnp.maximum(deg, 1.0))         # exact f32
        a_counts.append(counts.astype(jnp.bfloat16))

    # Pack lin_l / lin_r into one K=2*C_in weight, pre-cast to bf16.
    w_cats, biases = [], []
    for (w_l, b_l, w_r) in params:
        w_cats.append(jnp.concatenate([w_l, w_r], axis=0).astype(jnp.bfloat16))
        biases.append(b_l.astype(jnp.float32))

    x_bf16 = x.astype(jnp.bfloat16)
    hidden = params[-1][0].shape[1]
    n_out = layer_sizes[-1][1]

    kernel = functools.partial(
        _sage_fused_kernel, layer_sizes=layer_sizes, num_layers=num_layers)

    inputs = [*a_counts, *inv_degs, x_bf16]
    for w_cat, b in zip(w_cats, biases):
        inputs += [w_cat, b]

    # Tiny problem -> full-array blocks, no grid.  (For scaled workloads, tile
    # n_src as an "arbitrary" reduction axis and n_tgt as "parallel", with an
    # explicit vmem_limit_bytes; halve A tiles on v7x's 64 MiB VMEM.)
    full = lambda arr: pl.BlockSpec(arr.shape, lambda: (0,) * arr.ndim)
    scratch = [
        pltpu.VMEM((layer_sizes[i][1], params[i][0].shape[1]), jnp.bfloat16)
        for i in range(num_layers - 1)
    ]

    return pl.pallas_call(
        kernel,
        out_shape=jax.ShapeDtypeStruct((n_out, hidden), jnp.float32),
        in_specs=[full(a) for a in inputs],
        out_specs=pl.BlockSpec((n_out, hidden), lambda: (0, 0)),
        scratch_shapes=scratch,
    )(*inputs)


# ------------------------------ glue (JAX) --------------------------------- #

def build_count_adjacency(edge_index, n_src, n_tgt):
    """Dense count adjacency A[dst, src] (duplicate edges accumulate)."""
    src, dst = edge_index[0], edge_index[1]
    return jnp.zeros((n_tgt, n_src), jnp.float32).at[dst, src].add(1.0)


def init_sage_params(key, in_channels, hidden_channels, num_layers):
    """Deterministic SAGEConv parameters (glorot-uniform-ish)."""
    params = []
    c_in = in_channels
    for _ in range(num_layers):
        key, k1, k2, k3 = jax.random.split(key, 4)
        limit = (6.0 / (c_in + hidden_channels)) ** 0.5
        w_l = jax.random.uniform(k1, (c_in, hidden_channels), jnp.float32,
                                 -limit, limit)
        w_r = jax.random.uniform(k2, (c_in, hidden_channels), jnp.float32,
                                 -limit, limit)
        b_l = jax.random.uniform(k3, (1, hidden_channels), jnp.float32,
                                 -0.1, 0.1)
        params.append((w_l, b_l, w_r))
        c_in = hidden_channels
    return params


def sage_reference(x, adjs, params):
    """Pure-JAX f32 reference of SAGE.forward (eval mode)."""
    h = x
    num_layers = len(params)
    for i, ((ei, (ns, nt)), (w_l, b_l, w_r)) in enumerate(zip(adjs, params)):
        a = build_count_adjacency(ei, ns, nt)
        deg = jnp.maximum(jnp.sum(a, axis=1, keepdims=True), 1.0)
        agg = (a @ h) / deg
        out = agg @ w_l + b_l + h[:nt] @ w_r
        if i != num_layers - 1:
            out = jax.nn.relu(out)
        h = out
    return h


# --------------------------------- main ------------------------------------ #

if __name__ == "__main__":
    key = jax.random.PRNGKey(0)

    # in/hidden = 128 keeps every MXU operand and the output lane-dense, and
    # makes the fused-linear K = 2*C_in = 256 (exactly the v6e/v7x MXU depth).
    in_channels, hidden_channels, num_layers = 128, 128, 2
    n0, n1, n2 = 32, 16, 8          # sampled node counts per hop
    e0, e1 = 96, 48                 # edges per sampled bipartite graph

    key, kx, ke0a, ke0b, ke1a, ke1b, kp = jax.random.split(key, 7)
    x = jax.random.normal(kx, (n0, in_channels), jnp.float32)

    # adjs: list of (edge_index, size) — edge_index[0]=src idx, [1]=dst idx
    edge_index0 = jnp.stack([
        jax.random.randint(ke0a, (e0,), 0, n0),
        jax.random.randint(ke0b, (e0,), 0, n1),
    ])
    edge_index1 = jnp.stack([
        jax.random.randint(ke1a, (e1,), 0, n1),
        jax.random.randint(ke1b, (e1,), 0, n2),
    ])
    adjs = [(edge_index0, (n0, n1)), (edge_index1, (n1, n2))]

    params = init_sage_params(kp, in_channels, hidden_channels, num_layers)

    out = sage_forward(x, adjs, params)
    out = jax.block_until_ready(out)
    assert out.shape == (n2, hidden_channels), out.shape

    # Loose check vs. f32 reference (bf16 MXU operands -> ~1e-2-level diffs).
    ref = jax.block_until_ready(sage_reference(x, adjs, params))
    max_diff = float(jnp.max(jnp.abs(out - ref)))
    assert max_diff < 0.25, max_diff

    print("KERNEL_OK")
</pallas_src>

<mosaic_0001>
module attributes {stable_mosaic.version = 11 : i64} {
  func.func @_sage_fused_kernel(%arg0: memref<16x32xbf16, #tpu.memory_space<vmem>>, %arg1: memref<8x16xbf16, #tpu.memory_space<vmem>>, %arg2: memref<16x1xf32, #tpu.memory_space<vmem>>, %arg3: memref<8x1xf32, #tpu.memory_space<vmem>>, %arg4: memref<32x128xbf16, #tpu.memory_space<vmem>>, %arg5: memref<256x128xbf16, #tpu.memory_space<vmem>>, %arg6: memref<1x128xf32, #tpu.memory_space<vmem>>, %arg7: memref<256x128xbf16, #tpu.memory_space<vmem>>, %arg8: memref<1x128xf32, #tpu.memory_space<vmem>>, %arg9: memref<8x128xf32, #tpu.memory_space<vmem>>, %arg10: memref<16x128xbf16, #tpu.memory_space<vmem>>) attributes {dimension_semantics = [], scalar_prefetch = 0 : i64, scratch_operands = 1 : i64, tpu.core_type = #tpu.core_type<tc>} {
    %c0 = arith.constant 0 : index
    %c0_0 = arith.constant 0 : index
    %0 = vector.load %arg5[%c0, %c0_0] : memref<256x128xbf16, #tpu.memory_space<vmem>>, vector<256x128xbf16>
    %c0_1 = arith.constant 0 : index
    %c0_2 = arith.constant 0 : index
    %1 = vector.load %arg6[%c0_1, %c0_2] : memref<1x128xf32, #tpu.memory_space<vmem>>, vector<1x128xf32>
    %c0_3 = arith.constant 0 : index
    %c0_4 = arith.constant 0 : index
    %2 = vector.load %arg0[%c0_3, %c0_4] : memref<16x32xbf16, #tpu.memory_space<vmem>>, vector<16x32xbf16>
    %c0_5 = arith.constant 0 : index
    %c0_6 = arith.constant 0 : index
    %3 = vector.load %arg4[%c0_5, %c0_6] : memref<32x128xbf16, #tpu.memory_space<vmem>>, vector<32x128xbf16>
    %cst = arith.constant dense<0.000000e+00> : vector<16x128xf32>
    %4 = tpu.matmul %2, %3, %cst {dimension_numbers = #tpu.dot_dimension_numbers<[1], [0], [0], [1], [0, 0, 1, 1], [], []>} : vector<16x32xbf16>, vector<32x128xbf16>, vector<16x128xf32> -> vector<16x128xf32>
    %c0_7 = arith.constant 0 : index
    %c0_8 = arith.constant 0 : index
    %5 = vector.load %arg2[%c0_7, %c0_8] : memref<16x1xf32, #tpu.memory_space<vmem>>, vector<16x1xf32>
    %6 = vector.broadcast %5 : vector<16x1xf32> to vector<16x128xf32>
    %7 = arith.mulf %4, %6 : vector<16x128xf32>
    %c0_9 = arith.constant 0 : index
    %c0_10 = arith.constant 0 : index
    %8 = vector.load %arg4[%c0_9, %c0_10] : memref<32x128xbf16, #tpu.memory_space<vmem>>, vector<16x128xbf16>
    %9 = arith.truncf %7 : vector<16x128xf32> to vector<16x128xbf16>
    %10 = tpu.concatenate %9, %8 in 1 : vector<16x128xbf16>, vector<16x128xbf16> -> vector<16x256xbf16>
    %cst_11 = arith.constant dense<0.000000e+00> : vector<16x128xf32>
    %11 = tpu.matmul %10, %0, %cst_11 {dimension_numbers = #tpu.dot_dimension_numbers<[1], [0], [0], [1], [0, 0, 1, 1], [], []>} : vector<16x256xbf16>, vector<256x128xbf16>, vector<16x128xf32> -> vector<16x128xf32>
    %12 = vector.broadcast %1 : vector<1x128xf32> to vector<16x128xf32>
    %13 = arith.addf %11, %12 : vector<16x128xf32>
    %cst_12 = arith.constant 0.000000e+00 : f32
    %14 = vector.broadcast %cst_12 : f32 to vector<16x128xf32>
    %15 = arith.maximumf %13, %14 : vector<16x128xf32>
    %16 = arith.truncf %15 : vector<16x128xf32> to vector<16x128xbf16>
    %c0_13 = arith.constant 0 : index
    %c0_14 = arith.constant 0 : index
    %17 = vector.load %arg10[%c0_13, %c0_14] : memref<16x128xbf16, #tpu.memory_space<vmem>>, vector<16x128xbf16>
    tpu.vector_store %arg10[%c0_13, %c0_14], %16 {strides = array<i32>} : memref<16x128xbf16, #tpu.memory_space<vmem>>, vector<16x128xbf16>,
    %c0_15 = arith.constant 0 : index
    %c0_16 = arith.constant 0 : index
    %18 = vector.load %arg7[%c0_15, %c0_16] : memref<256x128xbf16, #tpu.memory_space<vmem>>, vector<256x128xbf16>
    %c0_17 = arith.constant 0 : index
    %c0_18 = arith.constant 0 : index
    %19 = vector.load %arg8[%c0_17, %c0_18] : memref<1x128xf32, #tpu.memory_space<vmem>>, vector<1x128xf32>
    %c0_19 = arith.constant 0 : index
    %c0_20 = arith.constant 0 : index
    %20 = vector.load %arg1[%c0_19, %c0_20] : memref<8x16xbf16, #tpu.memory_space<vmem>>, vector<8x16xbf16>
    %c0_21 = arith.constant 0 : index
    %c0_22 = arith.constant 0 : index
    %21 = vector.load %arg10[%c0_21, %c0_22] : memref<16x128xbf16, #tpu.memory_space<vmem>>, vector<16x128xbf16>
    %cst_23 = arith.constant dense<0.000000e+00> : vector<8x128xf32>
    %22 = tpu.matmul %20, %21, %cst_23 {dimension_numbers = #tpu.dot_dimension_numbers<[1], [0], [0], [1], [0, 0, 1, 1], [], []>} : vector<8x16xbf16>, vector<16x128xbf16>, vector<8x128xf32> -> vector<8x128xf32>
    %c0_24 = arith.constant 0 : index
    %c0_25 = arith.constant 0 : index
    %23 = vector.load %arg3[%c0_24, %c0_25] : memref<8x1xf32, #tpu.memory_space<vmem>>, vector<8x1xf32>
    %24 = vector.broadcast %23 : vector<8x1xf32> to vector<8x128xf32>
    %25 = arith.mulf %22, %24 : vector<8x128xf32>
    %c0_26 = arith.constant 0 : index
    %c0_27 = arith.constant 0 : index
    %26 = vector.load %arg10[%c0_26, %c0_27] : memref<16x128xbf16, #tpu.memory_space<vmem>>, vector<8x128xbf16>
    %27 = arith.truncf %25 : vector<8x128xf32> to vector<8x128xbf16>
    %28 = tpu.concatenate %27, %26 in 1 : vector<8x128xbf16>, vector<8x128xbf16> -> vector<8x256xbf16>
    %cst_28 = arith.constant dense<0.000000e+00> : vector<8x128xf32>
    %29 = tpu.matmul %28, %18, %cst_28 {dimension_numbers = #tpu.dot_dimension_numbers<[1], [0], [0], [1], [0, 0, 1, 1], [], []>} : vector<8x256xbf16>, vector<256x128xbf16>, vector<8x128xf32> -> vector<8x128xf32>
    %30 = vector.broadcast %19 : vector<1x128xf32> to vector<8x128xf32>
    %31 = arith.addf %29, %30 : vector<8x128xf32>
    %c0_29 = arith.constant 0 : index
    %c0_30 = arith.constant 0 : index
    %32 = vector.load %arg9[%c0_29, %c0_30] : memref<8x128xf32, #tpu.memory_space<vmem>>, vector<8x128xf32>
    tpu.vector_store %arg9[%c0_29, %c0_30], %31 {strides = array<i32>} : memref<8x128xf32, #tpu.memory_space<vmem>>, vector<8x128xf32>,
    return
  }
}

</mosaic_0001>

<bundles_post_ra>
// kernel: tpu_custom_call.1
= control target key start
LH: loop header
LB: loop body
LE: loop exit
PB: predicated region body
PF: predicated region fallthrough
CT: control target
= control target key end

     0   :  { %14 = vsyncpa [#allocation4], 0  ;;  %s925_s0 = inlined_call_operand.vmem [shape: bf16[16,32], index: 0, kind: input, shape index: {}]   ;;  %s926_s1 = inlined_call_operand.vmem [shape: bf16[8,16], index: 1, kind: input, shape index: {}]   ;;  %s927_s2 = inlined_call_operand.vmem [shape: f32[16,1], index: 2, kind: input, shape index: {}]   ;;  %s928_s3 = inlined_call_operand.vmem [shape: f32[8,1], index: 3, kind: input, shape index: {}]   ;;  %s929_s4 = inlined_call_operand.vmem [shape: bf16[32,128], index: 4, kind: input, shape index: {}]   ;;  %s930_s5 = inlined_call_operand.hbm [shape: bf16[256,128], index: 5, kind: input, shape index: {}]   ;;  %s931_s6 = inlined_call_operand.vmem [shape: f32[1,128], index: 6, kind: input, shape index: {}]   ;;  %s932_s7 = inlined_call_operand.hbm [shape: bf16[256,128], index: 7, kind: input, shape index: {}]   ;;  %s933_s8 = inlined_call_operand.vmem [shape: f32[1,128], index: 8, kind: input, shape index: {}]   ;;  %s934_s9 = inlined_call_operand.hbm [shape: f32[8,128], index: 9, kind: output, shape index: {}]  }
   0x1   :  { %15 = vsyncpa [#allocation7], 0 }
   0x2   :  { %16 = vsyncpa [#allocation5], 0  ;;  %s801_s30 = smov [#allocation3]   ;;  %s729_s13 = scalar_lea.hbm %s930_s5, 2048 }
   0x3   :  { %s32_s10 = sshll.u32 %s801_s30, 4  ;;  %p730_p0 = scmp.ne.s32.totalorder %s930_s5, %s729_s13  ;;  %s33_s10 = int_to_ptr.vmem [resolvable:$true] %s32_s10 }
   0x4   :  { %p733_p1 = scmp.lt.u32.totalorder %s729_s13, %s930_s5 }
   0x6   :  { %p735_p2 = pnand %p733_p1, %p730_p0 }
   0x8   :  { %738 = shalt.err (!%p735_p2)
}
   0x9   :  { %s739_s18 = scalar_lea.vmem %s33_s10, 2048  ;;  %p744_p4 = scmp.lt.s32.totalorder %s33_s10, %s33_s10 }
   0xa   :  { %p740_p3 = scmp.ne.s32.totalorder %s33_s10, %s739_s18  ;;  %p745_p5 = scmp.lt.s32.totalorder %s739_s18, %s739_s18 }
   0xc   :  { %p746_p6 = por %p745_p5, %p744_p4 }
   0xe   :  { %p747_p7 = pnand %p746_p6, %p740_p3 }
  0x10   :  { %750 = shalt.err (!%p747_p7)
}
  0x11   :  { %s802_s19 = smov 64   ;;  %s803_s20 = smov 4  }
  0x12   :  { %38 = dma.hbm_to_vmem [thread:$0]  %s930_s5, 2048, %s33_s10, [#allocation4], %s802_s19, %s802_s19, %s803_s20  }
  0x13   :  { %s804_s23 = smov [#allocation6]   ;;  %s751_s27 = scalar_lea.hbm %s932_s7, 2048 }
  0x14   :  { %s46_s24 = sshll.u32 %s804_s23, 4  ;;  %p752_p8 = scmp.ne.s32.totalorder %s932_s7, %s751_s27  ;;  %s47_s24 = int_to_ptr.vmem [resolvable:$true] %s46_s24 }
  0x15   :  { %p755_p9 = scmp.lt.u32.totalorder %s751_s27, %s932_s7 }
  0x17   :  { %p757_p10 = pnand %p755_p9, %p752_p8 }
  0x19   :  { %760 = shalt.err (!%p757_p10)
}
  0x1a   :  { %s761_s12 = scalar_lea.vmem %s47_s24, 2048  ;;  %p766_p12 = scmp.lt.s32.totalorder %s47_s24, %s47_s24 }
  0x1b   :  { %p762_p11 = scmp.ne.s32.totalorder %s47_s24, %s761_s12  ;;  %p767_p13 = scmp.lt.s32.totalorder %s761_s12, %s761_s12 }
  0x1d   :  { %p768_p0 = por %p767_p13, %p766_p12 }
  0x1f   :  { %p769_p1 = pnand %p768_p0, %p762_p11 }
  0x21   :  { %772 = shalt.err (!%p769_p1)
}
  0x22   :  { %52 = dma.hbm_to_vmem [thread:$0]  %s932_s7, 2048, %s47_s24, [#allocation7], %s802_s19, %s802_s19, %s803_s20  }
  0x23   :  { %795 = dma.done.wait [#allocation4], 2048  }
  0x24   :  { %796 = vsyncadd [#allocation4], 4294965248 }
  0x25   :  { %797 = dma.done.wait [#allocation7], 2048  }
  0x26   :  { %798 = vsyncadd [#allocation7], 4294965248  ;;  %v805_v0 = vmov 0.0   ;;  %vm806_vm0 = vmmov 0   ;;  %v807_v1 = vmov 0   ;;  %v693_v2 = vld [vmem:[%s929_s4] sm:$0xff]  }
  0x27   :  { %669 = vmatprep.subr.bf16.mxu1 %v805_v0  ;;  %673 = vmatprep.mubr.msk.bf16.mxu1 %vm806_vm0, %v805_v0  ;;  %v694_v3 = vld [vmem:[%s929_s4 + $0x8] sm:$0xff]   ;;  %v695_v4 = vld [vmem:[%s925_s0] sm:$0xff]   ;;  %vm118_vm1 = vcmask 261120   ;;  %v698_v9 = vld [vmem:[#allocation3 + $0x48] sm:$0xff]   ;;  %vm368_vm2 = vcmask 130048   ;;  %s808_s26 = smov [#allocation8]  }
  0x28   :  { %691 = vset.pattern.permute.xlu0 %v807_v1  ;;  %677 = vmatprep.subr.bf16.mxu0 %v805_v0  ;;  %v163_v5 = vld [vmem:[%s927_s2] sm:$0xff]  ;;  %v696_v6 = vld [vmem:[#allocation3 + $0x40] sm:$0xff]   ;;  %v699_v10 = vld [vmem:[#allocation3 + $0x8] sm:$0xff]   ;;  %s570_s27 = sshll.u32 %s808_s26, 4  ;;  %s571_s27 = int_to_ptr.vmem [resolvable:$true] %s570_s27 }
  0x29   :  { %679 = vmatprep.mubr.msk.bf16.mxu0 %vm806_vm0, %v805_v0  ;;  %692 = vset.pattern.permute.xlu1 %v807_v1  ;;  %v164_v7 = vld [vmem:[%s927_s2 + $0x8] sm:$0xff]  ;;  %v700_v11 = vld [vmem:[#allocation3 + $0x50] sm:$0xff]   ;;  %v702_v13 = vld [vmem:[#allocation3 + $0x58] sm:$0xff]   ;;  %s773_s28 = scalar_lea.vmem %s571_s27, 128  ;;  %p778_p3 = scmp.lt.s32.totalorder %s571_s27, %s571_s27 }
  0x2a   :  { %670 = vmatpush3.bf16.msra.mxu1 %v693_v2  ;;  %167 = vperm.xlu0 %691, %v163_v5   ;;  %v697_v8 = vld [vmem:[#allocation3] sm:$0xff]   ;;  %v701_v12 = vld [vmem:[#allocation3 + $0x10] sm:$0xff]   ;;  %v703_v14 = vld [vmem:[#allocation3 + $0x18] sm:$0xff]   ;;  %p774_p2 = scmp.ne.s32.totalorder %s571_s27, %s773_s28  ;;  %p779_p4 = scmp.lt.s32.totalorder %s773_s28, %s773_s28 }
  0x2b   :  { %671 = vmatprep.subr.bf16.mxu1 %v805_v0  ;;  %v704_v15 = vld [vmem:[#allocation3 + $0x60] sm:$0xff]   ;;  %v706_v17 = vld [vmem:[#allocation3 + $0x68] sm:$0xff]   ;;  %v708_v19 = vld [vmem:[#allocation3 + $0x70] sm:$0xff]  }
  0x2c   :  { %v705_v16 = vld [vmem:[#allocation3 + $0x20] sm:$0xff]   ;;  %v707_v18 = vld [vmem:[#allocation3 + $0x28] sm:$0xff]   ;;  %v709_v20 = vld [vmem:[#allocation3 + $0x30] sm:$0xff]   ;;  %p780_p5 = por %p779_p4, %p778_p3 }
  0x2d   :  { %v710_v21 = vld [vmem:[#allocation3 + $0x78] sm:$0xff]   ;;  %v713_v45 = vld [vmem:[#allocation6 + $0x40] sm:$0xff]   ;;  %v715_v49 = vld [vmem:[#allocation6 + $0x48] sm:$0xff]  }
  0x2e   :  { %672 = vmatpush3.bf16.msra.mxu1 %v694_v3  ;;  %172 = vperm.xlu0 %691, %v164_v7   ;;  %v711_v22 = vld [vmem:[#allocation3 + $0x38] sm:$0xff]   ;;  %v714_v48 = vld [vmem:[#allocation6] sm:$0xff]   ;;  %v716_v50 = vld [vmem:[#allocation6 + $0x8] sm:$0xff]   ;;  %p781_p6 = pnand %p780_p5, %p774_p2 }
  0x2f   :  { %623 = vmatprep.subr.bf16.mxu1 %v696_v6  ;;  %v712_v23 = vld [vmem:[%s929_s4] sm:$0xff]   ;;  %v717_v51 = vld [vmem:[#allocation6 + $0x50] sm:$0xff]   ;;  %v721_v56 = vld [vmem:[#allocation6 + $0x60] sm:$0xff]  }
  0x30   :  { %v412_v33 = vld [vmem:[%s928_s3] sm:$0xff]  ;;  %v718_v53 = vld [vmem:[#allocation6 + $0x10] sm:$0xff]   ;;  %v722_v57 = vld [vmem:[#allocation6 + $0x20] sm:$0xff]  }
  0x31   :  { %674 = vmatmul.mubr.msk.bf16.vlgmr.msra.gmra.mrb[0].mxu1 %vm118_vm1, %v695_v4  ;;  %415 = vperm.xlu1 %692, %v412_v33   ;;  %v585_v35 = vld [vmem:[%s931_s6] ss:$0 sm:$0xff]  ;;  %v723_v58 = vld [vmem:[#allocation6 + $0x68] sm:$0xff]   ;;  %v725_v60 = vld [vmem:[#allocation6 + $0x70] sm:$0xff]  }
  0x32   :  { %624 = vmatpush3.bf16.msra.mxu1 %v697_v8  ;;  %320 = vmatprep.mubr.bf16.mxu1 %v712_v23  ;;  %v366_v47 = vld [vmem:[%s926_s1] sm:$0xf]  ;;  %v724_v59 = vld [vmem:[#allocation6 + $0x28] sm:$0xff]   ;;  %v726_v61 = vld [vmem:[#allocation6 + $0x30] sm:$0xff]  }
  0x33   :  { %625 = vmatprep.subr.bf16.mxu1 %v698_v9  ;;  %v719_v54 = vld [vmem:[#allocation6 + $0x58] sm:$0xff]  }
  0x34   :  { %v720_v55 = vld [vmem:[#allocation6 + $0x18] sm:$0xff]  }
  0x35   :  { %v727_v62 = vld [vmem:[#allocation6 + $0x78] sm:$0xff]  }
  0x36   :  { %626 = vmatpush3.bf16.msra.mxu1 %v699_v10  ;;  %v728_v63 = vld [vmem:[#allocation6 + $0x38] sm:$0xff]  }
  0x37   :  { %627 = vmatprep.subr.bf16.mxu1 %v700_v11  ;;  %v603_v8 = vld [vmem:[%s933_s8] ss:$0 sm:$0xff] }
  0x3a   :  { %628 = vmatpush3.bf16.msra.mxu1 %v701_v12 }
  0x3b   :  { %629 = vmatprep.subr.bf16.mxu1 %v702_v13 }
  0x3e   :  { %630 = vmatpush3.bf16.msra.mxu1 %v703_v14 }
  0x3f   :  { %631 = vmatprep.subr.bf16.mxu1 %v704_v15 }
  0x42   :  { %632 = vmatpush3.bf16.msra.mxu1 %v705_v16 }
  0x43   :  { %633 = vmatprep.subr.bf16.mxu1 %v706_v17 }
  0x46   :  { %634 = vmatpush3.bf16.msra.mxu1 %v707_v18 }
  0x47   :  { %635 = vmatprep.subr.bf16.mxu1 %v708_v19 }
  0x4a   :  { %636 = vmatpush3.bf16.msra.mxu1 %v709_v20 }
  0x4b   :  { %637 = vmatprep.subr.bf16.mxu1 %v710_v21 }
  0x4e   :  { %638 = vmatpush3.bf16.msra.mxu1 %v711_v22 }
  0xa9   :  { %v168_v24 = vpop.permute.xlu0 %167 }
  0xad   :  { %v173_v27 = vpop.permute.xlu0 %172 }
  0xb0   :  { %v416_v0 = vpop.permute.xlu1 %415 }
 0x104   :  { %v156_v25 = vpop.f32.mrb[0].mxu1 }
 0x105   :  { %v675_v26 = vpop.f32.mrb[1].mxu1  ;;  %v175_v29 = vmul.f32 %v168_v24, %v156_v25 }
 0x106   :  { %v159_v28 = vpop.f32.mrb[2].mxu1 }
 0x107   :  { %v176_v30 = vmul.f32 %v173_v27, %v159_v28  ;;  %v676_v31 = vpop.f32.mrb[3].mxu1 }
 0x109   :  { %v179_v32 = vpack.c.bf16 %v176_v30, %v175_v29 }
 0x10b   :  { %321 = vmatmul.mubr.bf16.vlgmr.msra.gmra.mrb[4].mxu1 %v179_v32 }
 0x1de   :  { %v639_v34 = vpop.f32.mrb[4].mxu1 }
 0x1df   :  { %v640_v36 = vpop.f32.mrb[5].mxu1 }
 0x1e0   :  { %v641_v37 = vadd.f32 %v640_v36, %v639_v34  ;;  %v642_v38 = vpop.f32.mrb[6].mxu1 }
 0x1e1   :  { %v643_v39 = vpop.f32.mrb[7].mxu1 }
 0x1e2   :  { %v323_v40 = vadd.f32 %v641_v37, %v585_v35  ;;  %v644_v41 = vadd.f32 %v643_v39, %v642_v38 }
 0x1e4   :  { %v326_v42 = vadd.f32 %v644_v41, %v585_v35  ;;  %v329_v43 = vmax.f32 %v323_v40, 0.0 }
 0x1e6   :  { %v330_v44 = vmax.f32 %v326_v42, 0.0 }
 0x1e8   :  { %v331_v46 = vpack.c.bf16 %v330_v44, %v329_v43 }
 0x1ea   :  { %332 = vst [vmem:[#allocation2] sm:$0xff] %v331_v46  ;;  %678 = vmatpush3.bf16.msra.mxu0 %v331_v46 }
 0x1eb   :  { %647 = vmatprep.subr.bf16.mxu0 %v713_v45 }
 0x1ed   :  { %680 = vmatmul.mubr.msk.bf16.vlgmr.msra.gmra.mrb[0].mxu0 %vm368_vm2, %v366_v47 }
 0x1ee   :  { %648 = vmatpush3.bf16.msra.mxu0 %v714_v48 }
 0x1ef   :  { %649 = vmatprep.subr.bf16.mxu0 %v715_v49 }
 0x1f1   :  { %v419_v52 = vld [vmem:[#allocation2] sm:$0xf] }
 0x1f2   :  { %555 = vmatprep.mubr.bf16.mxu0 %v419_v52  ;;  %650 = vmatpush3.bf16.msra.mxu0 %v716_v50 }
 0x1f3   :  { %651 = vmatprep.subr.bf16.mxu0 %v717_v51 }
 0x1f6   :  { %652 = vmatpush3.bf16.msra.mxu0 %v718_v53 }
 0x1f7   :  { %653 = vmatprep.subr.bf16.mxu0 %v719_v54 }
 0x1fa   :  { %654 = vmatpush3.bf16.msra.mxu0 %v720_v55 }
 0x1fb   :  { %655 = vmatprep.subr.bf16.mxu0 %v721_v56 }
 0x1fe   :  { %656 = vmatpush3.bf16.msra.mxu0 %v722_v57 }
 0x1ff   :  { %657 = vmatprep.subr.bf16.mxu0 %v723_v58 }
 0x202   :  { %658 = vmatpush3.bf16.msra.mxu0 %v724_v59 }
 0x203   :  { %659 = vmatprep.subr.bf16.mxu0 %v725_v60 }
 0x206   :  { %660 = vmatpush3.bf16.msra.mxu0 %v726_v61 }
 0x207   :  { %661 = vmatprep.subr.bf16.mxu0 %v727_v62 }
 0x20a   :  { %662 = vmatpush3.bf16.msra.mxu0 %v728_v63 }
 0x2c0   :  { %v406_v1 = vpop.f32.mrb[0].mxu0 }
 0x2c1   :  { %v418_v2 = vmul.f32 %v416_v0, %v406_v1  ;;  %v681_v3 = vpop.f32.mrb[1].mxu0 }
 0x2c2   :  { %v409_v4 = vpop.f32.mrb[2].mxu0 }
 0x2c3   :  { %v420_v5 = vpack.c.bf16 %v418_v2, %v418_v2  ;;  %v682_v6 = vpop.f32.mrb[3].mxu0 }
 0x2c5   :  { %556 = vmatmul.mubr.bf16.vlgmr.msra.gmra.mrb[4].mxu0 %v420_v5 }
 0x398   :  { %v663_v7 = vpop.f32.mrb[4].mxu0 }
 0x399   :  { %v664_v9 = vpop.f32.mrb[5].mxu0 }
 0x39a   :  { %v665_v10 = vadd.f32 %v664_v9, %v663_v7  ;;  %v666_v11 = vpop.f32.mrb[6].mxu0 }
 0x39b   :  { %v667_v12 = vpop.f32.mrb[7].mxu0 }
 0x39c   :  { %v558_v13 = vadd.f32 %v665_v10, %v603_v8 }
 0x39e   :  { %563 = vst [vmem:[#allocation8] sm:$0xff] %v558_v13 }
 0x39f   :  { %784 = shalt.err (!%p781_p6)
}
 0x3a0   :  { %s785_s8 = scalar_lea.hbm %s934_s9, 128 }
 0x3a1   :  { %p786_p7 = scmp.ne.s32.totalorder %s934_s9, %s785_s8  ;;  %p789_p8 = scmp.lt.u32.totalorder %s785_s8, %s934_s9 }
 0x3a3   :  { %p791_p9 = pnand %p789_p8, %p786_p7 }
 0x3a5   :  { %794 = shalt.err (!%p791_p9)
}
 0x3a6   :  { %573 = dma.vmem_to_hbm [thread:$0]  %s571_s27, 128, %s934_s9, [#allocation5]  }
 0x3a7   :  { %799 = dma.done.wait [#allocation5], 128  }
 0x3a8   :  { %800 = vsyncadd [#allocation5], 4294967168 }
 0x3a9   :  { %577 = vsyncpa [#allocation4], 1 }
 0x3aa   :  { %578 = vsyncpa [#allocation7], 1 }
 0x3ab   :  { %579 = vsyncpa [#allocation5], 1 }

</bundles_post_ra>
